<compile_context>
chip_gen: v5e
topology: v5e:2x2
jax: 0.10.0
libtpu: 0.0.40
codegen_flags: <defaults>
</compile_context>

<pallas_src>
import functools

import jax
import jax.numpy as jnp
from jax.experimental import pallas as pl
from jax.experimental.pallas import tpu as pltpu

EPS = 1e-12  # torch.nn.functional.normalize default eps


# ----------------------------------------------------------------------------
# helpers
# ----------------------------------------------------------------------------

def _round_up(n, m):
    return (n + m - 1) // m * m


def _cdiv(a, b):
    return -(-a // b)


def _vmem_budget_bytes():
    """Usable scoped-VMEM budget: physical capacity minus a safety margin."""
    try:
        cap = int(pltpu.get_tpu_info().vmem_capacity_bytes)
    except Exception:
        cap = 64 << 20  # conservative fallback (v7x per-TC size)
    return max(cap - (16 << 20), 32 << 20)


def _pick_row_tiling(m, tm):
    """Balanced row tiles (padding < one tile); >=2 grid steps when m allows
    it so the 'parallel' axis can be split across both v7x TensorCores."""
    n_tiles = max(_cdiv(m, tm), 2 if m >= 16 else 1)
    tm_eff = _round_up(_cdiv(m, n_tiles), 8)
    n_tiles = _cdiv(m, tm_eff)
    return tm_eff, n_tiles


def _divisor_tks(d_in_p):
    """Candidate K tiles: multiples of 128 that divide d_in_p, descending."""
    q = d_in_p // 128
    return [128 * t for t in range(q, 0, -1) if q % t == 0]


# ----------------------------------------------------------------------------
# kernels
# ----------------------------------------------------------------------------

def _normalize_rows(y):
    # y / max(||y||, eps) == y * rsqrt(max(sum(y^2), eps^2))  (sqrt monotone)
    sq = jnp.sum(y * y, axis=-1, keepdims=True)
    inv = jax.lax.rsqrt(jnp.maximum(sq, EPS * EPS))
    return y * inv


def _kernel_resident_w(x_ref, w_ref, b_ref, o_ref):
    x = x_ref[...]
    w = w_ref[...]
    if x.dtype != w.dtype:
        x = x.astype(w.dtype)  # in-kernel bf16 cast: no extra HBM pass over x
    y = jnp.dot(x, w, preferred_element_type=jnp.float32)
    y = y + b_ref[...].astype(jnp.float32)
    o_ref[...] = _normalize_rows(y).astype(o_ref.dtype)


def _kernel_k_tiled(x_ref, w_ref, b_ref, o_ref, acc_ref):
    k = pl.program_id(1)

    @pl.when(k == 0)
    def _():
        acc_ref[...] = jnp.zeros_like(acc_ref)

    x = x_ref[...]
    w = w_ref[...]
    if x.dtype != w.dtype:
        x = x.astype(w.dtype)
    acc_ref[...] += jnp.dot(x, w, preferred_element_type=jnp.float32)

    @pl.when(k == pl.num_programs(1) - 1)
    def _():
        y = acc_ref[...] + b_ref[...].astype(jnp.float32)
        o_ref[...] = _normalize_rows(y).astype(o_ref.dtype)


# ----------------------------------------------------------------------------
# wrapper
# ----------------------------------------------------------------------------

@functools.partial(jax.jit, static_argnames=("d_out", "tm", "force_tk"))
def _reduce_dim_padded(x, w_p, b_p, *, d_out, tm=512, force_tk=0):
    """x: (..., d_in);  w_p: (d_in_p, d_out_p) pre-transposed/padded weight;
    b_p: (1, d_out_p) f32 padded bias.  Returns (..., d_out) with x.dtype."""
    d_in = x.shape[-1]
    lead = x.shape[:-1]
    d_in_p, d_out_p = w_p.shape
    out_dtype = x.dtype

    x2d = x.reshape(-1, d_in)
    m = x2d.shape[0]

    x_sz = jnp.dtype(x.dtype).itemsize
    w_sz = jnp.dtype(w_p.dtype).itemsize
    o_sz = jnp.dtype(out_dtype).itemsize
    budget = _vmem_budget_bytes()

    tm_eff, n_row_tiles = _pick_row_tiling(m, tm)

    def simple_fp(tmx):
        return (2 * tmx * d_in_p * x_sz          # double-buffered x tiles
                + d_in_p * d_out_p * w_sz        # resident W (single buffer)
                + d_out_p * 4                    # resident bias
                + 2 * tmx * d_out_p * o_sz)      # double-buffered out tiles

    def k_fp(tmx, tk):
        return (2 * tmx * tk * x_sz
                + 2 * tk * d_out_p * w_sz
                + d_out_p * 4
                + 2 * tmx * d_out_p * o_sz
                + tmx * d_out_p * 4)             # f32 accumulator scratch

    # ---- strategy: resident W if it fits the VMEM budget, else K-tiled ----
    if force_tk:
        use_k, tk = True, int(force_tk)
        assert d_in_p % tk == 0, "force_tk must divide the padded d_in"
    elif simple_fp(tm_eff) <= budget:
        use_k, tk = False, d_in_p
    else:
        use_k = True
        tk = None
        while tk is None:
            tk = next((t for t in _divisor_tks(d_in_p)
                       if k_fp(tm_eff, t) <= budget), None)
            if tk is None:
                if tm_eff <= 8:
                    tk = 128   # smallest possible; let Mosaic manage the rest
                else:
                    tm_eff = max(_round_up(tm_eff // 2, 8), 8)
        n_row_tiles = _cdiv(m, tm_eff)

    m_p = tm_eff * n_row_tiles
    needed = k_fp(tm_eff, tk) if use_k else simple_fp(tm_eff)
    vmem_limit = int(min(needed * 5 // 4 + (2 << 20), budget))
    vmem_limit = max(vmem_limit, 16 << 20)

    # Zero padding is exact: padded x cols x padded W rows contribute 0 to the
    # matmul; padded output cols are 0 (bias padded with 0) so the L2 norm is
    # unchanged; padded rows are sliced off before returning.
    if (m_p, d_in_p) != (m, d_in):
        x2d = jnp.pad(x2d, ((0, m_p - m), (0, d_in_p - d_in)))

    if not use_k:
        out = pl.pallas_call(
            _kernel_resident_w,
            out_shape=jax.ShapeDtypeStruct((m_p, d_out_p), out_dtype),
            grid_spec=pltpu.PrefetchScalarGridSpec(
                num_scalar_prefetch=0,
                grid=(n_row_tiles,),
                in_specs=[
                    pl.BlockSpec((tm_eff, d_in_p), lambda i: (i, 0)),
                    # constant index_map -> single-buffer the resident weight
                    pl.BlockSpec((d_in_p, d_out_p), lambda i: (0, 0),
                                 pipeline_mode=pl.Buffered(1)),
                    pl.BlockSpec((1, d_out_p), lambda i: (0, 0),
                                 pipeline_mode=pl.Buffered(1)),
                ],
                out_specs=pl.BlockSpec((tm_eff, d_out_p), lambda i: (i, 0)),
            ),
            compiler_params=pltpu.CompilerParams(
                dimension_semantics=("parallel",),
                vmem_limit_bytes=vmem_limit),
        )(x2d, w_p, b_p)
    else:
        n_k = d_in_p // tk
        out = pl.pallas_call(
            _kernel_k_tiled,
            out_shape=jax.ShapeDtypeStruct((m_p, d_out_p), out_dtype),
            grid_spec=pltpu.PrefetchScalarGridSpec(
                num_scalar_prefetch=0,
                grid=(n_row_tiles, n_k),
                in_specs=[
                    pl.BlockSpec((tm_eff, tk), lambda i, k: (i, k)),
                    pl.BlockSpec((tk, d_out_p), lambda i, k: (k, 0)),
                    pl.BlockSpec((1, d_out_p), lambda i, k: (0, 0),
                                 pipeline_mode=pl.Buffered(1)),
                ],
                out_specs=pl.BlockSpec((tm_eff, d_out_p), lambda i, k: (i, 0)),
                scratch_shapes=[pltpu.VMEM((tm_eff, d_out_p), jnp.float32)],
            ),
            compiler_params=pltpu.CompilerParams(
                dimension_semantics=("parallel", "arbitrary"),
                vmem_limit_bytes=vmem_limit),
        )(x2d, w_p, b_p)

    out = out[:m, :d_out]
    return out.reshape(*lead, d_out)


def prepare_reduce_dim_params(weight, bias, *, matmul_dtype=jnp.bfloat16):
    """Hoist W transpose / 128-padding / bf16 cast out of the per-call path.

    weight: (d_out, d_in) nn.Linear convention; bias: (d_out,).
    Returns (w_padded (d_in_p, d_out_p), b_padded (1, d_out_p) f32).
    """
    d_out, d_in = weight.shape
    d_in_p = _round_up(d_in, 128)
    d_out_p = _round_up(d_out, 128)
    w = weight.T
    if matmul_dtype is not None:
        w = w.astype(matmul_dtype)
    if (d_in_p, d_out_p) != (d_in, d_out):
        w = jnp.pad(w, ((0, d_in_p - d_in), (0, d_out_p - d_out)))
    b = bias.astype(jnp.float32).reshape(1, d_out)
    if d_out_p != d_out:
        b = jnp.pad(b, ((0, 0), (0, d_out_p - d_out)))
    return w, b


def make_reduce_dim(weight, bias, *, matmul_dtype=jnp.bfloat16, tm=512):
    """Init-time factory: prepares padded params once, returns apply(x)."""
    d_out = weight.shape[0]
    w_p, b_p = prepare_reduce_dim_params(weight, bias, matmul_dtype=matmul_dtype)

    def apply(x, *, force_tk=0):
        return _reduce_dim_padded(x, w_p, b_p, d_out=d_out, tm=tm,
                                  force_tk=force_tk)

    return apply


def reduce_dim(x, weight, bias, *, matmul_dtype=jnp.bfloat16, tm=512,
               force_tk=0):
    """One-shot convenience wrapper (prefer make_reduce_dim for repeated calls)."""
    return make_reduce_dim(weight, bias, matmul_dtype=matmul_dtype, tm=tm)(
        x, force_tk=force_tk)


# ----------------------------------------------------------------------------
# tests
# ----------------------------------------------------------------------------

def _reference(x, weight, bias):
    y = x @ weight.T + bias
    denom = jnp.maximum(jnp.linalg.norm(y, axis=-1, keepdims=True), EPS)
    return y / denom


if __name__ == "__main__":
    key = jax.random.PRNGKey(0)

    # --- Test 1: module-like small shapes, f32 MXU path, tight tolerance ----
    B, S, D_IN, D_OUT = 2, 8, 32, 16
    k1, k2, k3, key = jax.random.split(key, 4)
    x = jax.random.normal(k1, (B, S, D_IN), dtype=jnp.float32)
    bound = 1.0 / (D_IN ** 0.5)
    weight = jax.random.uniform(k2, (D_OUT, D_IN), jnp.float32, -bound, bound)
    bias = jax.random.uniform(k3, (D_OUT,), jnp.float32, -bound, bound)

    out = jax.block_until_ready(reduce_dim(x, weight, bias, matmul_dtype=None))
    ref = _reference(x, weight, bias)
    assert out.shape == (B, S, D_OUT)
    assert jnp.allclose(out, ref, atol=1e-5, rtol=1e-5), "mismatch (test 1)"

    # --- Test 2: ragged rows + non-128 feature dims, default bf16 MXU path --
    B2, S2, D_IN2, D_OUT2 = 3, 5, 40, 20
    k1, k2, k3, key = jax.random.split(key, 4)
    x2 = jax.random.normal(k1, (B2, S2, D_IN2), dtype=jnp.float32)
    bound2 = 1.0 / (D_IN2 ** 0.5)
    w2 = jax.random.uniform(k2, (D_OUT2, D_IN2), jnp.float32, -bound2, bound2)
    b2 = jax.random.uniform(k3, (D_OUT2,), jnp.float32, -bound2, bound2)

    out2 = jax.block_until_ready(reduce_dim(x2, w2, b2))  # bf16 matmul, f32 acc
    ref2 = _reference(x2, w2, b2)
    assert out2.shape == (B2, S2, D_OUT2)
    assert jnp.allclose(out2, ref2, atol=2e-2, rtol=2e-2), "mismatch (test 2)"

    # --- Test 3: force the K-tiled reduction path (v7x large-weight fallback)
    B3, S3, D_IN3, D_OUT3 = 2, 8, 256, 64
    k1, k2, k3, key = jax.random.split(key, 4)
    x3 = jax.random.normal(k1, (B3, S3, D_IN3), dtype=jnp.float32)
    bound3 = 1.0 / (D_IN3 ** 0.5)
    w3 = jax.random.uniform(k2, (D_OUT3, D_IN3), jnp.float32, -bound3, bound3)
    b3 = jax.random.uniform(k3, (D_OUT3,), jnp.float32, -bound3, bound3)

    out3 = jax.block_until_ready(
        reduce_dim(x3, w3, b3, matmul_dtype=None, force_tk=128))  # 2 K-steps
    ref3 = _reference(x3, w3, b3)
    assert out3.shape == (B3, S3, D_OUT3)
    assert jnp.allclose(out3, ref3, atol=1e-5, rtol=1e-5), "mismatch (test 3)"

    print("KERNEL_OK")
</pallas_src>

<mosaic_0001>
module attributes {stable_mosaic.version = 11 : i64} {
  func.func @_kernel_resident_w(%arg0: i32, %arg1: memref<8x128xf32, #tpu.memory_space<vmem>>, %arg2: memref<128x128xf32, #tpu.memory_space<vmem>>, %arg3: memref<1x128xf32, #tpu.memory_space<vmem>>, %arg4: memref<8x128xf32, #tpu.memory_space<vmem>>) attributes {dimension_semantics = [#tpu.dimension_semantics<parallel>], iteration_bounds = array<i64: 2>, scalar_prefetch = 0 : i64, scratch_operands = 0 : i64, tpu.core_type = #tpu.core_type<tc>, window_params = [{transform_indices = @transform_0, window_bounds = array<i64: 8, 128>}, {pipeline_mode = #tpu.pipeline_mode<synchronous>, transform_indices = @transform_1, window_bounds = array<i64: 128, 128>}, {pipeline_mode = #tpu.pipeline_mode<synchronous>, transform_indices = @transform_2, window_bounds = array<i64: 1, 128>}, {transform_indices = @transform_3, window_bounds = array<i64: 8, 128>}]} {
    %c0 = arith.constant 0 : index
    %c0_0 = arith.constant 0 : index
    %0 = vector.load %arg1[%c0, %c0_0] : memref<8x128xf32, #tpu.memory_space<vmem>>, vector<8x128xf32>
    %c0_1 = arith.constant 0 : index
    %c0_2 = arith.constant 0 : index
    %1 = vector.load %arg2[%c0_1, %c0_2] : memref<128x128xf32, #tpu.memory_space<vmem>>, vector<128x128xf32>
    %cst = arith.constant dense<0.000000e+00> : vector<8x128xf32>
    %2 = tpu.matmul %0, %1, %cst {dimension_numbers = #tpu.dot_dimension_numbers<[1], [0], [0], [1], [0, 0, 1, 1], [], []>} : vector<8x128xf32>, vector<128x128xf32>, vector<8x128xf32> -> vector<8x128xf32>
    %c0_3 = arith.constant 0 : index
    %c0_4 = arith.constant 0 : index
    %3 = vector.load %arg3[%c0_3, %c0_4] : memref<1x128xf32, #tpu.memory_space<vmem>>, vector<1x128xf32>
    %4 = vector.broadcast %3 : vector<1x128xf32> to vector<8x128xf32>
    %5 = arith.addf %2, %4 : vector<8x128xf32>
    %6 = arith.mulf %5, %5 : vector<8x128xf32>
    %cst_5 = arith.constant dense<0.000000e+00> : vector<8xf32>
    %7 = vector.multi_reduction <add>, %6, %cst_5 [1] : vector<8x128xf32> to vector<8xf32>
    %8 = vector.shape_cast %7 : vector<8xf32> to vector<8x1xf32>
    %cst_6 = arith.constant 1.000000e-24 : f32
    %9 = vector.broadcast %cst_6 : f32 to vector<8x1xf32>
    %10 = arith.maximumf %8, %9 : vector<8x1xf32>
    %11 = math.rsqrt %10 : vector<8x1xf32>
    %12 = vector.broadcast %11 : vector<8x1xf32> to vector<8x128xf32>
    %13 = arith.mulf %5, %12 : vector<8x128xf32>
    %c0_7 = arith.constant 0 : index
    %c0_8 = arith.constant 0 : index
    %14 = vector.load %arg4[%c0_7, %c0_8] : memref<8x128xf32, #tpu.memory_space<vmem>>, vector<8x128xf32>
    tpu.vector_store %arg4[%c0_7, %c0_8], %13 {strides = array<i32>} : memref<8x128xf32, #tpu.memory_space<vmem>>, vector<8x128xf32>,
    return
  }
  func.func @transform_0(%arg0: i32) -> (i32, i32) {
    %c0_i32 = arith.constant 0 : i32
    %c0_i32_0 = arith.constant 0 : i32
    return %arg0, %c0_i32 : i32, i32
  }
  func.func @transform_1(%arg0: i32) -> (i32, i32) {
    %c0_i32 = arith.constant 0 : i32
    %c0_i32_0 = arith.constant 0 : i32
    %c0_i32_1 = arith.constant 0 : i32
    return %c0_i32, %c0_i32_0 : i32, i32
  }
  func.func @transform_2(%arg0: i32) -> (i32, i32) {
    %c0_i32 = arith.constant 0 : i32
    %c0_i32_0 = arith.constant 0 : i32
    %c0_i32_1 = arith.constant 0 : i32
    return %c0_i32, %c0_i32_0 : i32, i32
  }
  func.func @transform_3(%arg0: i32) -> (i32, i32) {
    %c0_i32 = arith.constant 0 : i32
    %c0_i32_0 = arith.constant 0 : i32
    return %arg0, %c0_i32 : i32, i32
  }
}

</mosaic_0001>

<bundles_post_ra>
// kernel: _reduce_dim_padded.1
= control target key start
LH: loop header
LB: loop body
LE: loop exit
PB: predicated region body
PF: predicated region fallthrough
CT: control target
= control target key end

     0   :  { %8 = vsyncpa [#allocation3], 0  ;;  %s405_s12 = smov 0   ;;  %s436_s0 = inlined_call_operand.vmem [shape: f32[16,128], index: 0, kind: input, shape index: {}]   ;;  %s437_s1 = inlined_call_operand.hbm [shape: f32[128,128], index: 1, kind: input, shape index: {}]   ;;  %s438_s2 = inlined_call_operand.vmem [shape: f32[1,128], index: 2, kind: input, shape index: {}]   ;;  %s439_s3 = inlined_call_operand.vmem [shape: f32[16,128], index: 3, kind: output, shape index: {}]  }
   0x1 LB: > { %s124_s15 = sshll.u32 %s437_s1, 4  ;;  %s414_s16 = sadd.s32 4294967295, %s380_s12   ;;  %s380_s12 = sphi %s405_s12, %s14_s12   ;;  %s125_s15 = int_to_ptr.hbm [resolvable:$true] %s124_s15 }
   0x2   : > { %p307_p0 = scmp.ge.s32.totalorder %s380_s12, 1  ;;  %p113_p1 = scmp.lt.s32.totalorder %s380_s12, 3 }
   0x3   : > { %p324_p2 = scmp.eq.s32.totalorder %s414_s16, 0  ;;  %s382_s17 = smov [#allocation2]  }
   0x4   : > { %p114_p3 = pnand %p307_p0, %p113_p1  ;;  %s126_s18 = sshll.u32 %s382_s17, 4  ;;  %s127_s18 = int_to_ptr.vmem [resolvable:$true] %s126_s18 }
   0x5   : > { %s383_s19 = smov 128   ;;  %s384_s20 = smov 8  }
   0x6   : > { %p320_p4 = pneg %p114_p3  ;;  %152 = sbr.rel (%p114_p3) target bundleno = 313 (0x139), region = 32 }
   0x8   : > { %p321_p5 = pnand %p324_p2, %p320_p4 }
   0xa   : > { %323 = dma.hbm_to_vmem [thread:$0]  (!%p321_p5), %s125_s15, 2048, %s127_s18, [#allocation3], %s383_s19, %s383_s19, %s384_s20  }
   0xb   : > { %375 = dma.done.wait (%p324_p2), [#allocation3], 2048  }
   0xc   : > { %377 = vsyncadd (%p324_p2), [#allocation3], 4294965248  ;;  %v199_v0 = vld [vmem:[#allocation2 + $0x78] sm:$0xff]  ;;  %v198_v1 = vld [vmem:[#allocation2 + $0x70] sm:$0xff]  ;;  %p175_p6 = scmp.lt.s32.totalorder %s414_s16, 1 }
   0xd   : > { %204 = vmatpush.msra.mxu0 %v199_v0  ;;  %v197_v2 = vld [vmem:[#allocation2 + $0x68] sm:$0xff]  ;;  %v196_v3 = vld [vmem:[#allocation2 + $0x60] sm:$0xff]  ;;  %v195_v4 = vld [vmem:[#allocation2 + $0x58] sm:$0xff] }
   0xe   : > { %v194_v5 = vld [vmem:[#allocation2 + $0x50] sm:$0xff]  ;;  %v193_v6 = vld [vmem:[#allocation2 + $0x48] sm:$0xff]  ;;  %v192_v7 = vld [vmem:[#allocation2 + $0x40] sm:$0xff]  ;;  %s441_s16 = smov (!%p175_p6, %s414_s16), 1 }
   0xf   : > { %205 = vmatpush.msra.mxu0 %v198_v1  ;;  %v191_v8 = vld [vmem:[#allocation2 + $0x38] sm:$0xff]  ;;  %v190_v9 = vld [vmem:[#allocation2 + $0x30] sm:$0xff]  ;;  %v189_v10 = vld [vmem:[#allocation2 + $0x28] sm:$0xff]  ;;  %s312_s21 = sshll.u32 %s441_s16, 3 }
  0x10   : > { %v188_v11 = vld [vmem:[#allocation2 + $0x20] sm:$0xff]  ;;  %v187_v12 = vld [vmem:[#allocation2 + $0x18] sm:$0xff]  ;;  %v186_v13 = vld [vmem:[#allocation2 + $0x10] sm:$0xff]  ;;  %s178_s24 = scalar_lea.vmem %s436_s0, %s312_s21  ;;  %s182_s29 = scalar_lea.vmem %s439_s3, %s312_s21 }
  0x11   : > { %206 = vmatpush.msra.mxu0 %v197_v2  ;;  %v185_v14 = vld [vmem:[#allocation2 + $0x8] sm:$0xff]  ;;  %v184_v15 = vld [vmem:[#allocation2] sm:$0xff] }
  0x12   : > { %v183_v16 = vld [vmem:[%s178_s24] sm:$0xff] }
  0x13   : > { %207 = vmatpush.msra.mxu0 %v196_v3  ;;  %v337_v17 = vld [vmem:[%s438_s2] ss:$0 sm:$0xff] }
  0x15   : > { %208 = vmatpush.msra.mxu0 %v195_v4 }
  0x17   : > { %209 = vmatpush.msra.mxu0 %v194_v5 }
  0x19   : > { %210 = vmatpush.msra.mxu0 %v193_v6 }
  0x1b   : > { %211 = vmatpush.msra.mxu0 %v192_v7 }
  0x1d   : > { %212 = vmatpush.msra.mxu0 %v191_v8 }
  0x1f   : > { %213 = vmatpush.msra.mxu0 %v190_v9 }
  0x21   : > { %214 = vmatpush.msra.mxu0 %v189_v10 }
  0x23   : > { %215 = vmatpush.msra.mxu0 %v188_v11 }
  0x25   : > { %216 = vmatpush.msra.mxu0 %v187_v12 }
  0x27   : > { %217 = vmatpush.msra.mxu0 %v186_v13 }
  0x29   : > { %218 = vmatpush.msra.mxu0 %v185_v14 }
  0x2b   : > { %219 = vmatpush.msra.mxu0 %v184_v15 }
  0x2c   : > { %220 = vmatmul.f32.vlgmr.msra.gmra.mxu0 %v183_v16 }
  0xa9   : > { %v221_v18 = vpop.f32.mrf.mxu0 }
  0xaa   : > { %v222_v19 = vadd.f32 %v337_v17, %v221_v18 }
  0xac   : > { %v224_v20 = vmul.f32 %v222_v19, %v222_v19 }
  0xae   : > { %225 = vadd.xlane.f32.xlu0 %v224_v20 }
 0x121   : > { %v226_v21 = vpop.xlane.xlu0 %225 }
 0x122   : > { %v227_v22 = vmax.f32 %v226_v21, 1e-24 }
 0x124   : > { %338 = vrsqrt.f32 %v227_v22  ;;  %vm234_vm1 = vweird.f32 %v227_v22 }
 0x12a   : > { %v339_v23 = vpop.eup %338 }
 0x12b   : > { %v229_v24 = vmul.f32 %v339_v23, %v227_v22  ;;  %vm235_vm0 = vweird.f32 %v339_v23 }
 0x12c   : > { %vm236_vm2 = vmor %vm234_vm1, %vm235_vm0 }
 0x12d   : > { %v230_v25 = vmul.f32 %v339_v23, %v229_v24 }
 0x12f   : > { %v231_v26 = vmul.f32 0.5, %v230_v25 }
 0x131   : > { %v232_v27 = vsub.f32 1.5, %v231_v26 }
 0x133   : > { %v233_v28 = vmul.f32 %v339_v23, %v232_v27 }
 0x135   : > { %v237_v29 = vsel %vm236_vm2, %v339_v23, %v233_v28 }
 0x136   : > { %v238_v30 = vmul.f32 %v237_v29, %v222_v19 }
 0x138   : > { %239 = vst [vmem:[%s182_s29] sm:$0xff] %v238_v30 }
 0x139 PF: > { %s14_s12 = sadd.s32 1, %s380_s12  }
 0x13a   : > { %p11_p7 = scmp.ge.s32.totalorder %s14_s12, 4  }
 0x13c   :  { %13 = sbr.rel (!%p11_p7) target bundleno = 1 (0x1), region = 67 }
 0x141   :  { %259 = vsyncpa [#allocation3], 1 }
 0x142   :  { %261 = vsyncpa [#allocation3 + $0x1], 1 }

</bundles_post_ra>
